<compile_context>
chip_gen: v7x
topology: tpu7x:2x2x1
jax: 0.10.0
libtpu: 0.0.40
codegen_flags: <defaults>
</compile_context>

<pallas_src>
import jax
import jax.numpy as jnp
import numpy as np
from jax.experimental import pallas as pl
from jax.experimental.pallas import tpu as pltpu


def _round_up(x, m):
    return ((x + m - 1) // m) * m


def dqn_kernel(x_ref, w1_ref, b1_ref, w2_ref, b2_ref, w3_ref, b3_ref, o_ref):
    x = x_ref[...]
    # fc1 + ReLU
    h1 = jnp.dot(x, w1_ref[...], preferred_element_type=jnp.float32) + b1_ref[...]
    h1 = jnp.maximum(h1, 0.0)
    # fc2 + ReLU
    h2 = jnp.dot(h1, w2_ref[...], preferred_element_type=jnp.float32) + b2_ref[...]
    h2 = jnp.maximum(h2, 0.0)
    # fc3 (no activation) — narrow (nb_actions-wide) store; no lane padding.
    o_ref[...] = (jnp.dot(h2, w3_ref[...], preferred_element_type=jnp.float32)
                  + b3_ref[...]).astype(o_ref.dtype)


def dqn_forward(x, params, *, block_b=8192):
    """x: [B, input_shape] float32.
    params: dict with w1,b1,w2,b2,w3,b3; weights stored [in, out], biases [1, out]."""
    B, F = x.shape
    nb_actions = params["w3"].shape[1]

    # Batch tile: multiple of 8 sublanes. Aim for >= 2 grid steps when B is large
    # enough so v7x's two TensorCores both get work; cap at block_b for VMEM.
    tb = min(block_b, max(8, _round_up(pl.cdiv(B, 2), 8)))
    grid = (pl.cdiv(B, tb),)  # ragged last tile: OOB writes dropped, rows independent

    out = pl.pallas_call(
        dqn_kernel,
        out_shape=jax.ShapeDtypeStruct((B, nb_actions), jnp.float32),
        grid=grid,
        in_specs=[
            # streamed batch tile
            pl.BlockSpec((tb, F), lambda i: (i, 0)),
            # weights/biases: constant block index -> fetched once, resident in VMEM
            pl.BlockSpec(params["w1"].shape, lambda i: (0, 0)),
            pl.BlockSpec(params["b1"].shape, lambda i: (0, 0)),
            pl.BlockSpec(params["w2"].shape, lambda i: (0, 0)),
            pl.BlockSpec(params["b2"].shape, lambda i: (0, 0)),
            pl.BlockSpec(params["w3"].shape, lambda i: (0, 0)),
            pl.BlockSpec(params["b3"].shape, lambda i: (0, 0)),
        ],
        out_specs=pl.BlockSpec((tb, nb_actions), lambda i: (i, 0)),
        compiler_params=pltpu.CompilerParams(
            dimension_semantics=("parallel",),  # shard batch tiles across TCs (v7x)
        ),
    )(x, params["w1"], params["b1"], params["w2"], params["b2"],
      params["w3"], params["b3"])
    return out


def init_params(key, input_shape, nb_actions):
    """Deterministic init mimicking nn.Linear default (uniform(-1/sqrt(fan_in), 1/sqrt(fan_in)))."""
    ks = jax.random.split(key, 6)

    def linear(kw, kb, fan_in, fan_out):
        bound = 1.0 / np.sqrt(fan_in)
        w = jax.random.uniform(kw, (fan_in, fan_out), jnp.float32, -bound, bound)
        b = jax.random.uniform(kb, (1, fan_out), jnp.float32, -bound, bound)
        return w, b

    w1, b1 = linear(ks[0], ks[1], input_shape, 32)
    w2, b2 = linear(ks[2], ks[3], 32, 32)
    w3, b3 = linear(ks[4], ks[5], 32, nb_actions)
    return {"w1": w1, "b1": b1, "w2": w2, "b2": b2, "w3": w3, "b3": b3}


def dqn_ref(x, p):
    h1 = jnp.maximum(x @ p["w1"] + p["b1"], 0.0)
    h2 = jnp.maximum(h1 @ p["w2"] + p["b2"], 0.0)
    return h2 @ p["w3"] + p["b3"]


if __name__ == "__main__":
    key = jax.random.PRNGKey(0)
    k_in, k_par, k_big = jax.random.split(key, 3)

    input_shape = 16   # observation feature size
    nb_actions = 4

    params = init_params(k_par, input_shape, nb_actions)

    # Small-batch case (single tile path, batch divisible by 8).
    batch = 8
    x = jax.random.normal(k_in, (batch, input_shape), jnp.float32)
    out = jax.block_until_ready(dqn_forward(x, params))
    ref = jax.block_until_ready(dqn_ref(x, params))
    assert out.shape == (batch, nb_actions)
    np.testing.assert_allclose(np.asarray(out), np.asarray(ref), rtol=1e-5, atol=1e-5)

    # Larger, non-multiple batch to exercise the ragged-last-tile (cdiv grid) path.
    big_batch = 1030
    xb = jax.random.normal(k_big, (big_batch, input_shape), jnp.float32)
    out_b = jax.block_until_ready(dqn_forward(xb, params))          # tb≈520, grid=2
    ref_b = jax.block_until_ready(dqn_ref(xb, params))
    assert out_b.shape == (big_batch, nb_actions)
    np.testing.assert_allclose(np.asarray(out_b), np.asarray(ref_b), rtol=1e-5, atol=1e-5)

    # Also exercise a multi-tile grid with a ragged final tile (grid=3).
    out_c = jax.block_until_ready(dqn_forward(xb, params, block_b=512))
    np.testing.assert_allclose(np.asarray(out_c), np.asarray(ref_b), rtol=1e-5, atol=1e-5)

    print("KERNEL_OK")
</pallas_src>

<mosaic_0001>
module attributes {stable_mosaic.version = 11 : i64} {
  func.func @dqn_kernel(%arg0: i32, %arg1: memref<8x16xf32, #tpu.memory_space<vmem>>, %arg2: memref<16x32xf32, #tpu.memory_space<vmem>>, %arg3: memref<1x32xf32, #tpu.memory_space<vmem>>, %arg4: memref<32x32xf32, #tpu.memory_space<vmem>>, %arg5: memref<1x32xf32, #tpu.memory_space<vmem>>, %arg6: memref<32x4xf32, #tpu.memory_space<vmem>>, %arg7: memref<1x4xf32, #tpu.memory_space<vmem>>, %arg8: memref<8x4xf32, #tpu.memory_space<vmem>>) attributes {dimension_semantics = [#tpu.dimension_semantics<parallel>], iteration_bounds = array<i64: 1>, scalar_prefetch = 0 : i64, scratch_operands = 0 : i64, tpu.core_type = #tpu.core_type<tc>, window_params = [{transform_indices = @transform_0, window_bounds = array<i64: 8, 16>}, {pipeline_mode = #tpu.pipeline_mode<synchronous>, transform_indices = @transform_1, window_bounds = array<i64: 16, 32>}, {pipeline_mode = #tpu.pipeline_mode<synchronous>, transform_indices = @transform_2, window_bounds = array<i64: 1, 32>}, {pipeline_mode = #tpu.pipeline_mode<synchronous>, transform_indices = @transform_3, window_bounds = array<i64: 32, 32>}, {pipeline_mode = #tpu.pipeline_mode<synchronous>, transform_indices = @transform_4, window_bounds = array<i64: 1, 32>}, {pipeline_mode = #tpu.pipeline_mode<synchronous>, transform_indices = @transform_5, window_bounds = array<i64: 32, 4>}, {pipeline_mode = #tpu.pipeline_mode<synchronous>, transform_indices = @transform_6, window_bounds = array<i64: 1, 4>}, {transform_indices = @transform_7, window_bounds = array<i64: 8, 4>}]} {
    %c0 = arith.constant 0 : index
    %c0_0 = arith.constant 0 : index
    %0 = vector.load %arg1[%c0, %c0_0] : memref<8x16xf32, #tpu.memory_space<vmem>>, vector<8x16xf32>
    %c0_1 = arith.constant 0 : index
    %c0_2 = arith.constant 0 : index
    %1 = vector.load %arg2[%c0_1, %c0_2] : memref<16x32xf32, #tpu.memory_space<vmem>>, vector<16x32xf32>
    %cst = arith.constant dense<0.000000e+00> : vector<8x32xf32>
    %2 = tpu.matmul %0, %1, %cst {dimension_numbers = #tpu.dot_dimension_numbers<[1], [0], [0], [1], [0, 0, 1, 1], [], []>} : vector<8x16xf32>, vector<16x32xf32>, vector<8x32xf32> -> vector<8x32xf32>
    %c0_3 = arith.constant 0 : index
    %c0_4 = arith.constant 0 : index
    %3 = vector.load %arg3[%c0_3, %c0_4] : memref<1x32xf32, #tpu.memory_space<vmem>>, vector<1x32xf32>
    %4 = vector.broadcast %3 : vector<1x32xf32> to vector<8x32xf32>
    %5 = arith.addf %2, %4 : vector<8x32xf32>
    %cst_5 = arith.constant 0.000000e+00 : f32
    %6 = vector.broadcast %cst_5 : f32 to vector<8x32xf32>
    %7 = arith.maximumf %5, %6 : vector<8x32xf32>
    %c0_6 = arith.constant 0 : index
    %c0_7 = arith.constant 0 : index
    %8 = vector.load %arg4[%c0_6, %c0_7] : memref<32x32xf32, #tpu.memory_space<vmem>>, vector<32x32xf32>
    %cst_8 = arith.constant dense<0.000000e+00> : vector<8x32xf32>
    %9 = tpu.matmul %7, %8, %cst_8 {dimension_numbers = #tpu.dot_dimension_numbers<[1], [0], [0], [1], [0, 0, 1, 1], [], []>} : vector<8x32xf32>, vector<32x32xf32>, vector<8x32xf32> -> vector<8x32xf32>
    %c0_9 = arith.constant 0 : index
    %c0_10 = arith.constant 0 : index
    %10 = vector.load %arg5[%c0_9, %c0_10] : memref<1x32xf32, #tpu.memory_space<vmem>>, vector<1x32xf32>
    %11 = vector.broadcast %10 : vector<1x32xf32> to vector<8x32xf32>
    %12 = arith.addf %9, %11 : vector<8x32xf32>
    %cst_11 = arith.constant 0.000000e+00 : f32
    %13 = vector.broadcast %cst_11 : f32 to vector<8x32xf32>
    %14 = arith.maximumf %12, %13 : vector<8x32xf32>
    %c0_12 = arith.constant 0 : index
    %c0_13 = arith.constant 0 : index
    %15 = vector.load %arg6[%c0_12, %c0_13] : memref<32x4xf32, #tpu.memory_space<vmem>>, vector<32x4xf32>
    %cst_14 = arith.constant dense<0.000000e+00> : vector<8x4xf32>
    %16 = tpu.matmul %14, %15, %cst_14 {dimension_numbers = #tpu.dot_dimension_numbers<[1], [0], [0], [1], [0, 0, 1, 1], [], []>} : vector<8x32xf32>, vector<32x4xf32>, vector<8x4xf32> -> vector<8x4xf32>
    %c0_15 = arith.constant 0 : index
    %c0_16 = arith.constant 0 : index
    %17 = vector.load %arg7[%c0_15, %c0_16] : memref<1x4xf32, #tpu.memory_space<vmem>>, vector<1x4xf32>
    %18 = vector.broadcast %17 : vector<1x4xf32> to vector<8x4xf32>
    %19 = arith.addf %16, %18 : vector<8x4xf32>
    %c0_17 = arith.constant 0 : index
    %c0_18 = arith.constant 0 : index
    %20 = vector.load %arg8[%c0_17, %c0_18] : memref<8x4xf32, #tpu.memory_space<vmem>>, vector<8x4xf32>
    tpu.vector_store %arg8[%c0_17, %c0_18], %19 {strides = array<i32>} : memref<8x4xf32, #tpu.memory_space<vmem>>, vector<8x4xf32>,
    return
  }
  func.func @transform_0(%arg0: i32) -> (i32, i32) {
    %c0_i32 = arith.constant 0 : i32
    %c0_i32_0 = arith.constant 0 : i32
    return %arg0, %c0_i32 : i32, i32
  }
  func.func @transform_1(%arg0: i32) -> (i32, i32) {
    %c0_i32 = arith.constant 0 : i32
    %c0_i32_0 = arith.constant 0 : i32
    %c0_i32_1 = arith.constant 0 : i32
    return %c0_i32, %c0_i32_0 : i32, i32
  }
  func.func @transform_2(%arg0: i32) -> (i32, i32) {
    %c0_i32 = arith.constant 0 : i32
    %c0_i32_0 = arith.constant 0 : i32
    %c0_i32_1 = arith.constant 0 : i32
    return %c0_i32, %c0_i32_0 : i32, i32
  }
  func.func @transform_3(%arg0: i32) -> (i32, i32) {
    %c0_i32 = arith.constant 0 : i32
    %c0_i32_0 = arith.constant 0 : i32
    %c0_i32_1 = arith.constant 0 : i32
    return %c0_i32, %c0_i32_0 : i32, i32
  }
  func.func @transform_4(%arg0: i32) -> (i32, i32) {
    %c0_i32 = arith.constant 0 : i32
    %c0_i32_0 = arith.constant 0 : i32
    %c0_i32_1 = arith.constant 0 : i32
    return %c0_i32, %c0_i32_0 : i32, i32
  }
  func.func @transform_5(%arg0: i32) -> (i32, i32) {
    %c0_i32 = arith.constant 0 : i32
    %c0_i32_0 = arith.constant 0 : i32
    %c0_i32_1 = arith.constant 0 : i32
    return %c0_i32, %c0_i32_0 : i32, i32
  }
  func.func @transform_6(%arg0: i32) -> (i32, i32) {
    %c0_i32 = arith.constant 0 : i32
    %c0_i32_0 = arith.constant 0 : i32
    %c0_i32_1 = arith.constant 0 : i32
    return %c0_i32, %c0_i32_0 : i32, i32
  }
  func.func @transform_7(%arg0: i32) -> (i32, i32) {
    %c0_i32 = arith.constant 0 : i32
    %c0_i32_0 = arith.constant 0 : i32
    return %arg0, %c0_i32 : i32, i32
  }
}

</mosaic_0001>

<bundles_post_ra>
// kernel: tpu_custom_call.1
= control target key start
LH: loop header
LB: loop body
LE: loop exit
PB: predicated region body
PF: predicated region fallthrough
CT: control target
= control target key end

     0   :  { %12 = vsyncpa [#allocation3], 0  ;;  %s395_s24 = smov [#allocation2]   ;;  %s495_s0 = inlined_call_operand.vmem [shape: f32[8,16], index: 0, kind: input, shape index: {}]   ;;  %s496_s1 = inlined_call_operand.hbm [shape: f32[16,32], index: 1, kind: input, shape index: {}]   ;;  %s497_s2 = inlined_call_operand.vmem [shape: f32[1,32], index: 2, kind: input, shape index: {}]   ;;  %s498_s3 = inlined_call_operand.vmem [shape: f32[32,32], index: 3, kind: input, shape index: {}]   ;;  %s499_s4 = inlined_call_operand.vmem [shape: f32[1,32], index: 4, kind: input, shape index: {}]   ;;  %s500_s5 = inlined_call_operand.vmem [shape: f32[32,4], index: 5, kind: input, shape index: {}]   ;;  %s501_s6 = inlined_call_operand.vmem [shape: f32[1,4], index: 6, kind: input, shape index: {}]   ;;  %s502_s7 = inlined_call_operand.vmem [shape: f32[8,4], index: 7, kind: output, shape index: {}]  }
   0x1   :  { %s20_s25 = sshll.u32 %s395_s24, 4  ;;  %s371_s28 = scalar_lea.hbm %s496_s1, 256  ;;  %s21_s25 = int_to_ptr.vmem [resolvable:$true] %s20_s25 }
   0x2   :  { %p372_p0 = scmp.ne.s32.totalorder %s496_s1, %s371_s28  ;;  %p375_p1 = scmp.lt.u32.totalorder %s371_s28, %s496_s1 }
   0x4   :  { %p377_p2 = pnand %p375_p1, %p372_p0 }
   0x6   :  { %380 = shalt.err (!%p377_p2)
}
   0x7   :  { %s381_s10 = scalar_lea.vmem %s21_s25, 256  ;;  %p386_p4 = scmp.lt.s32.totalorder %s21_s25, %s21_s25 }
   0x8   :  { %p382_p3 = scmp.ne.s32.totalorder %s21_s25, %s381_s10  ;;  %p387_p5 = scmp.lt.s32.totalorder %s381_s10, %s381_s10 }
   0xa   :  { %p388_p6 = por %p387_p5, %p386_p4 }
   0xc   :  { %p389_p7 = pnand %p388_p6, %p382_p3 }
   0xe   :  { %392 = shalt.err (!%p389_p7)
}
   0xf   :  { %s396_s11 = smov 128   ;;  %s397_s12 = smov 8  }
  0x10   :  { %26 = dma.hbm_to_vmem [thread:$0]  %s496_s1, 256, %s21_s25, [#allocation3], %s396_s11, %s396_s11, %s397_s12  }
  0x11   :  { %393 = dma.done.wait [#allocation3], 256  }
  0x12   :  { %394 = vsyncadd [#allocation3], 4294967040  ;;  %v398_v0 = vmov 0.0|0.0   ;;  %vm399_vm0 = vmmov 0   ;;  %v400_v1 = vmov 0.0   ;;  %v41_v2 = vld [vmem:[#allocation2] sm:$0xff] }
  0x13   :  { %350 = vmatprep.subr.bf16.mxu0 %v398_v0  ;;  %325 = vmatprep.mubr.msk.f32.mxu0 %vm399_vm0, %v400_v1  ;;  %v42_v3 = vld [vmem:[#allocation2 + $0x8] sm:$0xff]  ;;  %v125_v5 = vld [vmem:[%s498_s3] sm:$0xff]  ;;  %vm50_vm1 = vcmask 130048   ;;  %v127_v9 = vld [vmem:[%s498_s3 + $0x10] sm:$0xff]  ;;  %vm136_vm2 = vcmask 261120   ;;  %vm295_vm3 = vcmask 31744  }
  0x14   :  { %353 = vmatprep.subr.bf16.mxu1 %v398_v0  ;;  %336 = vmatprep.mubr.msk.f32.mxu1 %vm399_vm0, %v400_v1  ;;  %v351_v4 = vpack.c.bf16 %v42_v3, %v41_v2  ;;  %v126_v6 = vld [vmem:[%s498_s3 + $0x8] sm:$0xff]  ;;  %v40_v8 = vld [vmem:[%s495_s0] sm:$0xff]  ;;  %v128_v10 = vld [vmem:[%s498_s3 + $0x18] sm:$0xff] }
  0x15   :  { %v354_v7 = vpack.c.bf16 %v126_v6, %v125_v5  ;;  %v357_v11 = vpack.c.bf16 %v128_v10, %v127_v9  ;;  %v211_v12 = vld [vmem:[%s500_s5] sm:$0xff]  ;;  %v212_v13 = vld [vmem:[%s500_s5 + $0x8] sm:$0xff]  ;;  %v213_v20 = vld [vmem:[%s500_s5 + $0x10] sm:$0xff] }
  0x16   :  { %352 = vmatpush3.bf16.msra.mxu0 %v351_v4  ;;  %v360_v14 = vpack.c.bf16 %v212_v13, %v211_v12  ;;  %v302_v15 = vld [vmem:[%s497_s2] ss:$0 sm:$0xff]  ;;  %v214_v21 = vld [vmem:[%s500_s5 + $0x18] sm:$0xff] }
  0x17   :  { %355 = vmatpush3.bf16.msra.mxu1 %v354_v7  ;;  %359 = vmatprep.subr.bf16.mxu0 %v398_v0  ;;  %v363_v22 = vpack.c.bf16 %v214_v21, %v213_v20  ;;  %v304_v23 = vld [vmem:[%s499_s4] ss:$0 sm:$0xff] }
  0x18   :  { %356 = vmatprep.subr.bf16.mxu1 %v398_v0  ;;  %v306_v28 = vld [vmem:[%s501_s6] ss:$0 sm:$0xff] }
  0x19   :  { %326 = vmatmul.mubr.msk.f32.vlgmr.msra.gmra.mrb[0].mxu0 %vm50_vm1, %v40_v8 }
  0x1a   :  { %347 = vmatprep.mubr.msk.f32.mxu0 %vm399_vm0, %v400_v1  ;;  %361 = vmatpush3.bf16.msra.mxu0 %v360_v14 }
  0x1b   :  { %358 = vmatpush3.bf16.msra.mxu1 %v357_v11  ;;  %362 = vmatprep.subr.bf16.mxu0 %v398_v0 }
  0x1e   :  { %364 = vmatpush3.bf16.msra.mxu0 %v363_v22 }
  0xec   :  { %v120_v16 = vpop.f32.mrb[0].mxu0 }
  0xed   :  { %v121_v17 = vadd.f32 %v302_v15, %v120_v16  ;;  %v327_v18 = vpop.f32.mrb[1].mxu0 }
  0xef   :  { %v124_v19 = vmax.f32 %v121_v17, 0.0 }
  0xf1   :  { %337 = vmatmul.mubr.msk.f32.vlgmr.msra.gmra.mrb[0].mxu1 %vm136_vm2, %v124_v19 }
 0x1c4   :  { %v206_v24 = vpop.f32.mrb[0].mxu1 }
 0x1c5   :  { %v207_v25 = vadd.f32 %v304_v23, %v206_v24  ;;  %v338_v26 = vpop.f32.mrb[1].mxu1 }
 0x1c7   :  { %v210_v27 = vmax.f32 %v207_v25, 0.0 }
 0x1c9   :  { %348 = vmatmul.mubr.msk.f32.vlgmr.msra.gmra.mrb[2].mxu0 %vm136_vm2, %v210_v27 }
 0x29c   :  { %v291_v29 = vpop.f32.mrb[2].mxu0 }
 0x29d   :  { %v292_v30 = vadd.f32 %v306_v28, %v291_v29  ;;  %v349_v31 = vpop.f32.mrb[3].mxu0 }
 0x29f   :  { %296 = vst.msk [vmem:[%s502_s7] sm:$0xff] %vm295_vm3, %v292_v30 }
 0x2a0   :  { %301 = vsyncpa [#allocation3], 1 }

</bundles_post_ra>
